<compile_context>
chip_gen: v7x
topology: tpu7x:2x2x1
jax: 0.10.0
libtpu: 0.0.40
codegen_flags: <defaults>
</compile_context>

<pallas_src>
import math

import jax
import jax.numpy as jnp
from jax.experimental import pallas as pl
from jax.experimental.pallas import tpu as pltpu


BN_EPS = 1e-5              # PyTorch BatchNorm1d default eps
SCALE_EPS = 1e-7           # the `+ 1e-07` in the module
SOFTPLUS_THRESHOLD = 20.0  # torch.nn.Softplus default threshold
LANE = 128


def _round_up(x, m):
    return ((x + m - 1) // m) * m


def _make_kernel(d_dim, zd_dim, b_actual, b_padded, b_tile):
    """Kernel factory; static shape info is baked in via closure."""
    inv_b = 1.0 / float(b_actual)
    need_row_mask = (b_padded != b_actual)

    def kernel(d_ref, w_ref, p_ref, out_ref, s1_ref, s2_ref):
        phase = pl.program_id(0)   # 0: BN stats pass, 1: normalize + heads
        tile = pl.program_id(1)    # batch tile index

        # fc1: d @ W1.  Bias omitted: training-mode BatchNorm subtracts the
        # batch mean, so the bias cancels exactly (output parity only; the
        # module's running stats are not tracked).
        h = jnp.dot(d_ref[...], w_ref[0:d_dim, :],
                    preferred_element_type=jnp.float32)        # [bt, W] f32

        @pl.when(jnp.logical_and(phase == 0, tile == 0))
        def _init():
            s1_ref[...] = jnp.zeros_like(s1_ref)
            s2_ref[...] = jnp.zeros_like(s2_ref)

        @pl.when(phase == 0)
        def _accumulate():
            hm = h
            if need_row_mask:
                # Padded batch rows are zero, but mask anyway so stats stay
                # correct even if the wrapper padding policy changes.
                row = (jax.lax.broadcasted_iota(jnp.int32, h.shape, 0)
                       + tile * b_tile)
                hm = jnp.where(row < b_actual, h, 0.0)
            s1_ref[...] += jnp.sum(hm, axis=0, keepdims=True)
            s2_ref[...] += jnp.sum(hm * hm, axis=0, keepdims=True)

        @pl.when(phase == 1)
        def _normalize_and_heads():
            # Single-pass (E[x^2]-E[x]^2) variance in f32; max(.,0) guards
            # cancellation.  Padded lanes have mean=var=0 -> hidden=0.
            mean = s1_ref[...] * inv_b
            var = jnp.maximum(s2_ref[...] * inv_b - mean * mean, 0.0)
            inv_std = jax.lax.rsqrt(var + BN_EPS)
            gamma = p_ref[0:1, :]
            beta = p_ref[1:2, :]
            b_heads = p_ref[2:3, :]

            hidden = jnp.maximum((h - mean) * inv_std * gamma + beta, 0.0)

            # Fused heads: one [W, W] matmul; columns [:zd] -> loc,
            # [zd:2zd] -> softplus + eps, the rest is lane padding.
            pre = jnp.dot(hidden.astype(w_ref.dtype), w_ref[d_dim:, :],
                          preferred_element_type=jnp.float32) + b_heads

            # Numerically-stable softplus (matches torch.nn.Softplus,
            # threshold=20); computed full width (EUP slot is cheap), column
            # selected so the store is one unmasked full-lane write.
            sp = jnp.where(
                pre > SOFTPLUS_THRESHOLD, pre,
                jnp.log1p(jnp.exp(jnp.minimum(pre, SOFTPLUS_THRESHOLD))))
            col = jax.lax.broadcasted_iota(jnp.int32, pre.shape, 1)
            out_ref[...] = jnp.where(col < zd_dim, pre, sp + SCALE_EPS)

    return kernel


def pzd_forward(d, params, *, b_tile=None, use_bf16=False):
    """d: [B, d_dim] -> (zd_loc [B, zd_dim], zd_scale [B, zd_dim]).

    The kernel produces one fused lane-dense [B, W] slab; loc/scale are
    slices of it (under jit, XLA fuses those slices into the consumers).
    """
    if d.ndim <= 1:                       # mirrors torch.unsqueeze(d, 1)
        d = d[:, None]
    d = d.astype(jnp.float32)
    B, d_dim = d.shape
    zd_dim = params["zd_dim"]
    w = params["w_packed"]                # [d_dim + W, W]
    p = params["p_packed"]                # [8, W]
    W = w.shape[1]
    assert w.shape[0] == d_dim + W

    # ---- batch tile: keep per-tile VMEM O(tile); 512 rows is conservative
    # even for v7x's 64 MiB VMEM.  bf16 packs (16,128) -> 16-row multiples.
    row_pack = 16 if use_bf16 else 8
    if b_tile is None:
        b_tile = min(_round_up(B, row_pack), 512)
    b_tile = max(_round_up(b_tile, row_pack), row_pack)
    nb = pl.cdiv(B, b_tile)
    b_padded = nb * b_tile
    if b_padded != B:
        d = jnp.pad(d, ((0, b_padded - B), (0, 0)))   # zero rows (masked in BN)

    in_dtype = jnp.bfloat16 if use_bf16 else jnp.float32
    d_in = d.astype(in_dtype)
    w_in = w.astype(in_dtype)

    kernel = _make_kernel(d_dim, zd_dim, B, b_padded, b_tile)

    # ---- VMEM budget from actual tile sizes (48 MiB cap: v7x headroom).
    isz = jnp.dtype(in_dtype).itemsize
    resident = w_in.size * isz + p.size * 4 + 2 * W * 4
    per_tile = (2 * b_tile * d_dim * isz      # double-buffered input tile
                + 2 * b_tile * W * 4          # double-buffered output tile
                + 6 * b_tile * W * 4)         # h / hidden / pre / sp temporaries
    vmem_limit = int(min(max(int(1.5 * (resident + per_tile)) + (1 << 20),
                             4 << 20), 48 << 20))

    cost = pl.CostEstimate(
        flops=int(2 * 2 * b_padded * d_dim * W      # fc1 (both phases)
                  + 2 * b_padded * W * W            # fused heads
                  + 12 * b_padded * W),             # BN / ReLU / softplus
        transcendentals=int(2 * b_padded * W),      # exp + log1p
        bytes_accessed=int(2 * d_in.size * isz + w_in.size * isz
                           + p.size * 4 + b_padded * W * 4),
    )

    out = pl.pallas_call(
        kernel,
        out_shape=jax.ShapeDtypeStruct((b_padded, W), jnp.float32),
        grid_spec=pltpu.PrefetchScalarGridSpec(
            num_scalar_prefetch=0,
            grid=(2, nb),                             # (phase, batch tile)
            in_specs=[
                pl.BlockSpec((b_tile, d_dim), lambda ph, i: (i, 0)),
                pl.BlockSpec(w_in.shape, lambda ph, i: (0, 0)),  # resident
                pl.BlockSpec(p.shape, lambda ph, i: (0, 0)),     # resident
            ],
            # Phase 0 never writes: pin its output mapping to block 0 so no
            # intermediate (junk) output writebacks are issued.
            out_specs=pl.BlockSpec((b_tile, W), lambda ph, i: (ph * i, 0)),
            scratch_shapes=[pltpu.VMEM((1, W), jnp.float32),   # sum(h)
                            pltpu.VMEM((1, W), jnp.float32)],  # sum(h*h)
        ),
        compiler_params=pltpu.CompilerParams(
            # Both axes sequential: batch tiles share the BN-stats scratch.
            dimension_semantics=("arbitrary", "arbitrary"),
            vmem_limit_bytes=vmem_limit,
        ),
        cost_estimate=cost,
    )(d_in, w_in, p)

    return out[:B, :zd_dim], out[:B, zd_dim:2 * zd_dim]


def _xavier_uniform(key, out_dim, in_dim):
    bound = math.sqrt(6.0 / (in_dim + out_dim))
    # PyTorch weight is [out, in]; we return the transpose [in, out].
    w = jax.random.uniform(key, (out_dim, in_dim), jnp.float32, -bound, bound)
    return w.T


def init_params(key, d_dim, zd_dim):
    k1, k2, k3, k4 = jax.random.split(key, 4)
    # fc1: xavier-uniform weight, default-init bias (kept for the reference;
    # the kernel drops it because training-mode BatchNorm cancels it).
    w1_t = _xavier_uniform(k1, zd_dim, d_dim)                   # [d_dim, zd]
    b1_bound = 1.0 / math.sqrt(d_dim)
    b1 = jax.random.uniform(k2, (1, zd_dim), jnp.float32, -b1_bound, b1_bound)
    # BatchNorm1d affine params (default init)
    gamma = jnp.ones((1, zd_dim), jnp.float32)
    beta = jnp.zeros((1, zd_dim), jnp.float32)
    # fc21 / fc22: xavier-uniform weights, zero biases (per module __init__)
    w21_t = _xavier_uniform(k3, zd_dim, zd_dim)
    b21 = jnp.zeros((1, zd_dim), jnp.float32)
    w22_t = _xavier_uniform(k4, zd_dim, zd_dim)
    b22 = jnp.zeros((1, zd_dim), jnp.float32)

    # ---- lane-dense packing for the kernel ----
    W = max(LANE, _round_up(2 * zd_dim, LANE))
    w1_pad = jnp.zeros((d_dim, W), jnp.float32).at[:, :zd_dim].set(w1_t)
    w_heads = jnp.zeros((W, W), jnp.float32)
    w_heads = w_heads.at[:zd_dim, :zd_dim].set(w21_t)
    w_heads = w_heads.at[:zd_dim, zd_dim:2 * zd_dim].set(w22_t)
    w_packed = jnp.concatenate([w1_pad, w_heads], axis=0)       # [d_dim+W, W]

    p_packed = jnp.zeros((8, W), jnp.float32)
    p_packed = p_packed.at[0, :zd_dim].set(gamma[0])            # row 0: gamma
    p_packed = p_packed.at[1, :zd_dim].set(beta[0])             # row 1: beta
    p_packed = p_packed.at[2, :zd_dim].set(b21[0])              # row 2: head bias
    p_packed = p_packed.at[2, zd_dim:2 * zd_dim].set(b22[0])

    return dict(zd_dim=zd_dim, w1_t=w1_t, b1=b1, gamma=gamma, beta=beta,
                w21_t=w21_t, b21=b21, w22_t=w22_t, b22=b22,
                w_packed=w_packed, p_packed=p_packed)


def _reference_forward(d, p):
    """Pure-JAX reference (includes the fc1 bias, unfused heads)."""
    h = d @ p["w1_t"] + p["b1"]
    mean = jnp.mean(h, axis=0, keepdims=True)
    var = jnp.mean((h - mean) ** 2, axis=0, keepdims=True)
    h = (h - mean) / jnp.sqrt(var + BN_EPS) * p["gamma"] + p["beta"]
    h = jnp.maximum(h, 0.0)
    loc = h @ p["w21_t"] + p["b21"]
    s = h @ p["w22_t"] + p["b22"]
    scale = jnp.where(
        s > SOFTPLUS_THRESHOLD, s,
        jnp.log1p(jnp.exp(jnp.minimum(s, SOFTPLUS_THRESHOLD)))) + SCALE_EPS
    return loc, scale


if __name__ == "__main__":
    # Small shapes consistent with the module: d is a domain code.
    B, D_DIM, ZD_DIM = 8, 16, 32

    key = jax.random.PRNGKey(0)
    k_in, k_par, k_in2 = jax.random.split(key, 3)
    params = init_params(k_par, D_DIM, ZD_DIM)

    d = jax.random.normal(k_in, (B, D_DIM), jnp.float32)
    zd_loc, zd_scale = pzd_forward(d, params)
    jax.block_until_ready((zd_loc, zd_scale))

    ref_loc, ref_scale = _reference_forward(d, params)
    assert zd_loc.shape == (B, ZD_DIM) and zd_scale.shape == (B, ZD_DIM)
    assert jnp.allclose(zd_loc, ref_loc, atol=1e-5, rtol=1e-5)
    assert jnp.allclose(zd_scale, ref_scale, atol=1e-5, rtol=1e-5)
    assert bool(jnp.all(zd_scale > 0.0))

    # Exercise the multi-tile / ragged-batch path (BN stats over the true B).
    B2 = 24
    d2 = jax.random.normal(k_in2, (B2, D_DIM), jnp.float32)
    loc2, scale2 = pzd_forward(d2, params, b_tile=16)
    jax.block_until_ready((loc2, scale2))
    ref_loc2, ref_scale2 = _reference_forward(d2, params)
    assert loc2.shape == (B2, ZD_DIM) and scale2.shape == (B2, ZD_DIM)
    assert jnp.allclose(loc2, ref_loc2, atol=1e-5, rtol=1e-5)
    assert jnp.allclose(scale2, ref_scale2, atol=1e-5, rtol=1e-5)

    print("KERNEL_OK")
</pallas_src>

<mosaic_0001>
module attributes {stable_mosaic.version = 11 : i64} {
  func.func @kernel(%arg0: i32, %arg1: i32, %arg2: memref<8x16xf32, #tpu.memory_space<vmem>>, %arg3: memref<144x128xf32, #tpu.memory_space<vmem>>, %arg4: memref<8x128xf32, #tpu.memory_space<vmem>>, %arg5: memref<8x128xf32, #tpu.memory_space<vmem>>, %arg6: memref<1x128xf32, #tpu.memory_space<vmem>>, %arg7: memref<1x128xf32, #tpu.memory_space<vmem>>) attributes {dimension_semantics = [#tpu.dimension_semantics<arbitrary>, #tpu.dimension_semantics<arbitrary>], iteration_bounds = array<i64: 2, 1>, scalar_prefetch = 0 : i64, scratch_operands = 2 : i64, tpu.core_type = #tpu.core_type<tc>, window_params = [{transform_indices = @transform_0, window_bounds = array<i64: 8, 16>}, {pipeline_mode = #tpu.pipeline_mode<synchronous>, transform_indices = @transform_1, window_bounds = array<i64: 144, 128>}, {pipeline_mode = #tpu.pipeline_mode<synchronous>, transform_indices = @transform_2, window_bounds = array<i64: 8, 128>}, {transform_indices = @transform_3, window_bounds = array<i64: 8, 128>}]} {
    %c0 = arith.constant 0 : index
    %c0_0 = arith.constant 0 : index
    %0 = vector.load %arg2[%c0, %c0_0] : memref<8x16xf32, #tpu.memory_space<vmem>>, vector<8x16xf32>
    %c0_1 = arith.constant 0 : index
    %c0_2 = arith.constant 0 : index
    %1 = vector.load %arg3[%c0_1, %c0_2] : memref<144x128xf32, #tpu.memory_space<vmem>>, vector<16x128xf32>
    %cst = arith.constant dense<0.000000e+00> : vector<8x128xf32>
    %2 = tpu.matmul %0, %1, %cst {dimension_numbers = #tpu.dot_dimension_numbers<[1], [0], [0], [1], [0, 0, 1, 1], [], []>} : vector<8x16xf32>, vector<16x128xf32>, vector<8x128xf32> -> vector<8x128xf32>
    %c0_i32 = arith.constant 0 : i32
    %3 = arith.cmpi eq, %arg0, %c0_i32 : i32
    %c0_i32_3 = arith.constant 0 : i32
    %4 = arith.cmpi eq, %arg1, %c0_i32_3 : i32
    %5 = arith.andi %3, %4 : i1
    %6 = arith.extui %5 : i1 to i32
    %c0_i32_4 = arith.constant 0 : i32
    %7 = arith.cmpi ne, %6, %c0_i32_4 : i32
    scf.if %7 {
      %cst_8 = arith.constant 0.000000e+00 : f32
      %14 = vector.broadcast %cst_8 : f32 to vector<1x128xf32>
      %c0_9 = arith.constant 0 : index
      %c0_10 = arith.constant 0 : index
      %15 = vector.load %arg6[%c0_9, %c0_10] : memref<1x128xf32, #tpu.memory_space<vmem>>, vector<1x128xf32>
      tpu.vector_store %arg6[%c0_9, %c0_10], %14 {strides = array<i32>} : memref<1x128xf32, #tpu.memory_space<vmem>>, vector<1x128xf32>,
      %cst_11 = arith.constant 0.000000e+00 : f32
      %16 = vector.broadcast %cst_11 : f32 to vector<1x128xf32>
      %c0_12 = arith.constant 0 : index
      %c0_13 = arith.constant 0 : index
      %17 = vector.load %arg7[%c0_12, %c0_13] : memref<1x128xf32, #tpu.memory_space<vmem>>, vector<1x128xf32>
      tpu.vector_store %arg7[%c0_12, %c0_13], %16 {strides = array<i32>} : memref<1x128xf32, #tpu.memory_space<vmem>>, vector<1x128xf32>,
    } else {
    }
    %c0_i32_5 = arith.constant 0 : i32
    %8 = arith.cmpi eq, %arg0, %c0_i32_5 : i32
    %9 = arith.extui %8 : i1 to i32
    %c0_i32_6 = arith.constant 0 : i32
    %10 = arith.cmpi ne, %9, %c0_i32_6 : i32
    scf.if %10 {
      %c0_8 = arith.constant 0 : index
      %c0_9 = arith.constant 0 : index
      %14 = vector.load %arg6[%c0_8, %c0_9] : memref<1x128xf32, #tpu.memory_space<vmem>>, vector<1x128xf32>
      %cst_10 = arith.constant dense<0.000000e+00> : vector<128xf32>
      %15 = vector.multi_reduction <add>, %2, %cst_10 [0] : vector<8x128xf32> to vector<128xf32>
      %16 = vector.shape_cast %15 : vector<128xf32> to vector<1x128xf32>
      %17 = arith.addf %14, %16 : vector<1x128xf32>
      %c0_11 = arith.constant 0 : index
      %c0_12 = arith.constant 0 : index
      %18 = vector.load %arg6[%c0_11, %c0_12] : memref<1x128xf32, #tpu.memory_space<vmem>>, vector<1x128xf32>
      tpu.vector_store %arg6[%c0_11, %c0_12], %17 {strides = array<i32>} : memref<1x128xf32, #tpu.memory_space<vmem>>, vector<1x128xf32>,
      %c0_13 = arith.constant 0 : index
      %c0_14 = arith.constant 0 : index
      %19 = vector.load %arg7[%c0_13, %c0_14] : memref<1x128xf32, #tpu.memory_space<vmem>>, vector<1x128xf32>
      %20 = arith.mulf %2, %2 : vector<8x128xf32>
      %cst_15 = arith.constant dense<0.000000e+00> : vector<128xf32>
      %21 = vector.multi_reduction <add>, %20, %cst_15 [0] : vector<8x128xf32> to vector<128xf32>
      %22 = vector.shape_cast %21 : vector<128xf32> to vector<1x128xf32>
      %23 = arith.addf %19, %22 : vector<1x128xf32>
      %c0_16 = arith.constant 0 : index
      %c0_17 = arith.constant 0 : index
      %24 = vector.load %arg7[%c0_16, %c0_17] : memref<1x128xf32, #tpu.memory_space<vmem>>, vector<1x128xf32>
      tpu.vector_store %arg7[%c0_16, %c0_17], %23 {strides = array<i32>} : memref<1x128xf32, #tpu.memory_space<vmem>>, vector<1x128xf32>,
    } else {
    }
    %c1_i32 = arith.constant 1 : i32
    %11 = arith.cmpi eq, %arg0, %c1_i32 : i32
    %12 = arith.extui %11 : i1 to i32
    %c0_i32_7 = arith.constant 0 : i32
    %13 = arith.cmpi ne, %12, %c0_i32_7 : i32
    scf.if %13 {
      %c0_8 = arith.constant 0 : index
      %c0_9 = arith.constant 0 : index
      %14 = vector.load %arg6[%c0_8, %c0_9] : memref<1x128xf32, #tpu.memory_space<vmem>>, vector<1x128xf32>
      %cst_10 = arith.constant 1.250000e-01 : f32
      %15 = vector.broadcast %cst_10 : f32 to vector<1x128xf32>
      %16 = arith.mulf %14, %15 : vector<1x128xf32>
      %c0_11 = arith.constant 0 : index
      %c0_12 = arith.constant 0 : index
      %17 = vector.load %arg7[%c0_11, %c0_12] : memref<1x128xf32, #tpu.memory_space<vmem>>, vector<1x128xf32>
      %cst_13 = arith.constant 1.250000e-01 : f32
      %18 = vector.broadcast %cst_13 : f32 to vector<1x128xf32>
      %19 = arith.mulf %17, %18 : vector<1x128xf32>
      %20 = arith.mulf %16, %16 : vector<1x128xf32>
      %21 = arith.subf %19, %20 : vector<1x128xf32>
      %cst_14 = arith.constant 0.000000e+00 : f32
      %22 = vector.broadcast %cst_14 : f32 to vector<1x128xf32>
      %23 = arith.maximumf %21, %22 : vector<1x128xf32>
      %cst_15 = arith.constant 9.99999974E-6 : f32
      %24 = vector.broadcast %cst_15 : f32 to vector<1x128xf32>
      %25 = arith.addf %23, %24 : vector<1x128xf32>
      %26 = math.rsqrt %25 : vector<1x128xf32>
      %c0_16 = arith.constant 0 : index
      %c0_17 = arith.constant 0 : index
      %27 = vector.load %arg4[%c0_16, %c0_17] : memref<8x128xf32, #tpu.memory_space<vmem>>, vector<1x128xf32>
      %c1 = arith.constant 1 : index
      %c0_18 = arith.constant 0 : index
      %28 = vector.load %arg4[%c1, %c0_18] : memref<8x128xf32, #tpu.memory_space<vmem>>, vector<1x128xf32>
      %c2 = arith.constant 2 : index
      %c0_19 = arith.constant 0 : index
      %29 = vector.load %arg4[%c2, %c0_19] : memref<8x128xf32, #tpu.memory_space<vmem>>, vector<1x128xf32>
      %30 = vector.broadcast %16 : vector<1x128xf32> to vector<8x128xf32>
      %31 = arith.subf %2, %30 : vector<8x128xf32>
      %32 = vector.broadcast %26 : vector<1x128xf32> to vector<8x128xf32>
      %33 = arith.mulf %31, %32 : vector<8x128xf32>
      %34 = vector.broadcast %27 : vector<1x128xf32> to vector<8x128xf32>
      %35 = arith.mulf %33, %34 : vector<8x128xf32>
      %36 = vector.broadcast %28 : vector<1x128xf32> to vector<8x128xf32>
      %37 = arith.addf %35, %36 : vector<8x128xf32>
      %cst_20 = arith.constant 0.000000e+00 : f32
      %38 = vector.broadcast %cst_20 : f32 to vector<8x128xf32>
      %39 = arith.maximumf %37, %38 : vector<8x128xf32>
      %c16 = arith.constant 16 : index
      %c0_21 = arith.constant 0 : index
      %40 = vector.load %arg3[%c16, %c0_21] : memref<144x128xf32, #tpu.memory_space<vmem>>, vector<128x128xf32>
      %cst_22 = arith.constant dense<0.000000e+00> : vector<8x128xf32>
      %41 = tpu.matmul %39, %40, %cst_22 {dimension_numbers = #tpu.dot_dimension_numbers<[1], [0], [0], [1], [0, 0, 1, 1], [], []>} : vector<8x128xf32>, vector<128x128xf32>, vector<8x128xf32> -> vector<8x128xf32>
      %42 = vector.broadcast %29 : vector<1x128xf32> to vector<8x128xf32>
      %43 = arith.addf %41, %42 : vector<8x128xf32>
      %cst_23 = arith.constant 2.000000e+01 : f32
      %44 = vector.broadcast %cst_23 : f32 to vector<8x128xf32>
      %45 = arith.cmpf ogt, %43, %44 : vector<8x128xf32>
      %cst_24 = arith.constant 2.000000e+01 : f32
      %46 = vector.broadcast %cst_24 : f32 to vector<8x128xf32>
      %47 = arith.minimumf %43, %46 : vector<8x128xf32>
      %48 = math.exp %47 : vector<8x128xf32>
      %49 = math.log1p %48 : vector<8x128xf32>
      %50 = arith.select %45, %43, %49 : vector<8x128xi1>, vector<8x128xf32>
      %51 = tpu.iota {dimensions = array<i32: 1>} : vector<8x128xi32>
      %c32_i32 = arith.constant 32 : i32
      %52 = vector.broadcast %c32_i32 : i32 to vector<8x128xi32>
      %53 = arith.cmpi slt, %51, %52 : vector<8x128xi32>
      %cst_25 = arith.constant 1.000000e-07 : f32
      %54 = vector.broadcast %cst_25 : f32 to vector<8x128xf32>
      %55 = arith.addf %50, %54 : vector<8x128xf32>
      %56 = arith.select %53, %43, %55 : vector<8x128xi1>, vector<8x128xf32>
      %c0_26 = arith.constant 0 : index
      %c0_27 = arith.constant 0 : index
      %57 = vector.load %arg5[%c0_26, %c0_27] : memref<8x128xf32, #tpu.memory_space<vmem>>, vector<8x128xf32>
      tpu.vector_store %arg5[%c0_26, %c0_27], %56 {strides = array<i32>} : memref<8x128xf32, #tpu.memory_space<vmem>>, vector<8x128xf32>,
    } else {
    }
    return
  }
  func.func @transform_0(%arg0: i32, %arg1: i32) -> (i32, i32) {
    %c0_i32 = arith.constant 0 : i32
    %c0_i32_0 = arith.constant 0 : i32
    return %arg1, %c0_i32 : i32, i32
  }
  func.func @transform_1(%arg0: i32, %arg1: i32) -> (i32, i32) {
    %c0_i32 = arith.constant 0 : i32
    %c0_i32_0 = arith.constant 0 : i32
    %c0_i32_1 = arith.constant 0 : i32
    return %c0_i32, %c0_i32_0 : i32, i32
  }
  func.func @transform_2(%arg0: i32, %arg1: i32) -> (i32, i32) {
    %c0_i32 = arith.constant 0 : i32
    %c0_i32_0 = arith.constant 0 : i32
    %c0_i32_1 = arith.constant 0 : i32
    return %c0_i32, %c0_i32_0 : i32, i32
  }
  func.func @transform_3(%arg0: i32, %arg1: i32) -> (i32, i32) {
    %0 = arith.muli %arg0, %arg1 : i32
    %c0_i32 = arith.constant 0 : i32
    %c0_i32_0 = arith.constant 0 : i32
    return %0, %c0_i32 : i32, i32
  }
}

</mosaic_0001>

<bundles_post_ra>
// kernel: tpu_custom_call.1
= control target key start
LH: loop header
LB: loop body
LE: loop exit
PB: predicated region body
PF: predicated region fallthrough
CT: control target
= control target key end

     0   :  { %8 = vsyncpa [#allocation5], 0  ;;  %s1106_s0 = inlined_call_operand.hbm [shape: f32[8,16], index: 0, kind: input, shape index: {}]   ;;  %s1107_s1 = inlined_call_operand.hbm [shape: f32[144,128], index: 1, kind: input, shape index: {}]   ;;  %s1108_s2 = inlined_call_operand.hbm [shape: f32[8,128], index: 2, kind: input, shape index: {}]   ;;  %s1109_s3 = inlined_call_operand.hbm [shape: f32[8,128], index: 3, kind: output, shape index: {}]  }
   0x1   :  { %9 = vsyncpa [#allocation8], 0 }
   0x2   :  { %10 = vsyncpa [#allocation6], 0 }
   0x3   :  { %12 = vsyncpa [#allocation6 + $0x1], 0  ;;  %s944_s12 = smov 0   ;;  %s946_s13 = smov 0  }
   0x4   :  { %s948_s14 = smov 0  }
   0x5 LB: > { %s911_s15 = smov [#allocation7]   ;;  %s572_s17 = sadd.s32 4294967295, %s909_s14   ;;  %s909_s14 = sphi %s948_s14, %s18_s14   ;;  %s905_s13 = sphi %s946_s13, %s1123_s13   ;;  %s901_s12 = sphi %s944_s12, %s1122_s12  }
   0x6   : > { %s156_s16 = sshll.u32 %s911_s15, 4  ;;  %s573_s18 = sadd.s32 4294967294, %s909_s14   ;;  %s157_s16 = int_to_ptr.vmem [resolvable:$true] %s156_s16 }
   0x7   : > { %p574_p0 = scmp.ge.s32.totalorder %s909_s14, 1  ;;  %p131_p1 = scmp.lt.s32.totalorder %s909_s14, 3 }
   0x8   : > { %p965_p2 = scmp.eq.s32.totalorder %s572_s17, 0  ;;  %s30_s22 = sadd.s32 1, %s905_s13 }
   0x9   : > { %p969_p3 = pnand %p574_p0, %p131_p1  ;;  %p982_p6 = scmp.ge.s32.totalorder %s30_s22, 2 }
   0xa   : > { %s1113_s19 = scalar_select %p965_p2, 1, 0 }
   0xb   : > { %s1114_s20 = scalar_select %p969_p3, 1, 0 }
   0xc   : > { %p699_p4 = pneg %p969_p3  ;;  %s765_s26 = scalar_lea.hbm %s1107_s1, 2304 }
   0xd   : > { %s1116_s23 = scalar_select %p982_p6, 1, 0 }
   0xe   : > { %p977_p5 = pnand %p965_p2, %p699_p4  ;;  %p766_p7 = scmp.ne.s32.totalorder %s1107_s1, %s765_s26 }
   0xf   : > { %p772_p11 = scmp.lt.u32.totalorder %s765_s26, %s1107_s1 }
  0x10   : > { %p994_p8 = pneg %p977_p5 }
  0x12   : > { %p768_p9 = pnand %p994_p8, %p766_p7 }
  0x14   : > { %p769_p10 = pneg %p768_p9 }
  0x16   : > { %p774_p12 = pnand %p772_p11, %p769_p10 }
  0x18   : > { %777 = shalt.err (!%p774_p12)
}
  0x19   : > { %s778_s5 = scalar_lea.vmem %s157_s16, 2304  ;;  %p786_p4 = scmp.lt.s32.totalorder %s157_s16, %s157_s16 }
  0x1a   : > { %p779_p13 = scmp.ne.s32.totalorder %s157_s16, %s778_s5  ;;  %p787_p2 = scmp.lt.s32.totalorder %s778_s5, %s778_s5 }
  0x1c   : > { %p781_p0 = pnand %p779_p13, %p994_p8  ;;  %p788_p3 = por %p787_p2, %p786_p4 }
  0x1e   : > { %p782_p1 = pneg %p781_p0 }
  0x20   : > { %p789_p6 = pnand %p788_p3, %p782_p1 }
  0x22   : > { %792 = shalt.err (!%p789_p6)
}
  0x23   : > { %s912_s6 = smov 128   ;;  %s913_s7 = smov 8  }
  0x24   : > { %705 = dma.hbm_to_vmem [thread:$0]  (!%p977_p5), %s1107_s1, 2304, %s157_s16, [#allocation8], %s912_s6, %s912_s6, %s913_s7  }
  0x25   : > { %p1118_p7 = scmp.ne.s32.totalorder %s1116_s23, 0  ;;  %s914_s10 = smov [#allocation4]  }
  0x26   : > { %s146_s11 = sshll.u32 %s914_s10, 4  ;;  %s915_s15 = smov [#allocation9]   ;;  %s147_s11 = int_to_ptr.vmem [resolvable:$true] %s146_s11 }
  0x27   : > { %s1125_s22 = smov (%p1118_p7, %s30_s22), 0  ;;  %s170_s24 = sshll.u32 %s915_s15, 4  ;;  %s171_s24 = int_to_ptr.vmem [resolvable:$true] %s170_s24 }
  0x28   : > { %s793_s27 = scalar_lea.hbm %s1106_s0, 128 }
  0x29   : > { %p794_p2 = scmp.ne.s32.totalorder %s1106_s0, %s793_s27  ;;  %p800_p9 = scmp.lt.u32.totalorder %s793_s27, %s1106_s0 }
  0x2b   : > { %p796_p3 = pnand %p794_p2, %p994_p8 }
  0x2d   : > { %p797_p6 = pneg %p796_p3 }
  0x2f   : > { %p802_p10 = pnand %p800_p9, %p797_p6 }
  0x31   : > { %805 = shalt.err (!%p802_p10)
}
  0x32   : > { %s806_s4 = scalar_lea.vmem %s147_s11, 128  ;;  %p814_p0 = scmp.lt.s32.totalorder %s147_s11, %s147_s11 }
  0x33   : > { %p807_p11 = scmp.ne.s32.totalorder %s147_s11, %s806_s4  ;;  %p815_p1 = scmp.lt.s32.totalorder %s806_s4, %s806_s4 }
  0x35   : > { %p809_p12 = pnand %p807_p11, %p994_p8  ;;  %p816_p4 = por %p815_p1, %p814_p0 }
  0x37   : > { %p810_p13 = pneg %p809_p12 }
  0x39   : > { %p817_p7 = pnand %p816_p4, %p810_p13 }
  0x3b   : > { %820 = shalt.err (!%p817_p7)
}
  0x3c   : > { %702 = dma.hbm_to_vmem [thread:$0]  (!%p977_p5), %s1106_s0, 128, %s147_s11, [#allocation5]  }
  0x3d   : > { %s821_s9 = scalar_lea.hbm %s1108_s2, 128 }
  0x3e   : > { %p822_p2 = scmp.ne.s32.totalorder %s1108_s2, %s821_s9  ;;  %p828_p9 = scmp.lt.u32.totalorder %s821_s9, %s1108_s2 }
  0x40   : > { %p824_p3 = pnand %p822_p2, %p994_p8 }
  0x42   : > { %p825_p6 = pneg %p824_p3 }
  0x44   : > { %p830_p10 = pnand %p828_p9, %p825_p6 }
  0x46   : > { %833 = shalt.err (!%p830_p10)
}
  0x47   : > { %s834_s27 = scalar_lea.vmem %s171_s24, 128  ;;  %p842_p0 = scmp.lt.s32.totalorder %s171_s24, %s171_s24 }
  0x48   : > { %p835_p11 = scmp.ne.s32.totalorder %s171_s24, %s834_s27  ;;  %p843_p1 = scmp.lt.s32.totalorder %s834_s27, %s834_s27 }
  0x4a   : > { %p837_p12 = pnand %p835_p11, %p994_p8  ;;  %p844_p4 = por %p843_p1, %p842_p0 }
  0x4c   : > { %p838_p13 = pneg %p837_p12 }
  0x4e   : > { %p845_p7 = pnand %p844_p4, %p838_p13 }
  0x50   : > { %848 = shalt.err (!%p845_p7)
}
  0x51   : > { %708 = dma.hbm_to_vmem [thread:$0]  (!%p977_p5), %s1108_s2, 128, %s171_s24, [#allocation8]  }
  0x52   : > { %p1119_p2 = scmp.ne.s32.totalorder %s1114_s20, 0 }
  0x53   : > { %p1120_p3 = scmp.ne.s32.totalorder (!%p1119_p2), %s1113_s19, 0 }
  0x54   : > { %183 = sbr.rel (%p1119_p2) target bundleno = 641 (0x281), region = 32 }
  0x5b   : > { %888 = dma.done.wait (%p1120_p3), [#allocation5], 128  }
  0x5c   : > { %890 = vsyncadd (%p1120_p3), [#allocation5], 4294967168 }
  0x5d   : > { %892 = dma.done.wait (%p1120_p3), [#allocation8], 2432  }
  0x5e   : > { %894 = vsyncadd (%p1120_p3), [#allocation8], 4294964864  ;;  %v916_v0 = vmov 0.0|0.0   ;;  %vm917_vm0 = vmmov 0   ;;  %v918_v1 = vmov 0.0   ;;  %v212_v2 = vld [vmem:[#allocation7] sm:$0xff] }
  0x5f   : > { %656 = vmatprep.subr.bf16.mxu0 %v916_v0  ;;  %618 = vmatprep.mubr.msk.f32.mxu0 %vm917_vm0, %v918_v1  ;;  %v213_v3 = vld [vmem:[#allocation7 + $0x8] sm:$0xff]  ;;  %v211_v5 = vld [vmem:[#allocation4] sm:$0xff]  ;;  %vm214_vm1 = vcmask 130048   ;;  %p288_p5 = scmp.eq.s32.totalorder %s901_s12, 0 }
  0x60   : > { %v657_v4 = vpack.c.bf16 %v213_v3, %v212_v2  ;;  %v919_v8 = vmov (%p288_p5), 0.0  }
  0x61   : > { %294 = vst [vmem:[#allocation2] sm:$0x1] (%p288_p5), %v919_v8  ;;  %295 = vst [vmem:[#allocation3] sm:$0x1] (%p288_p5), %v919_v8 }
  0x62   : > { %658 = vmatpush3.bf16.msra.mxu0 %v657_v4 }
  0x65   : > { %619 = vmatmul.mubr.msk.f32.vlgmr.msra.gmra.mrb[0].mxu0 %vm214_vm1, %v211_v5 }
 0x133   : > { %293 = sbr.rel (!%p288_p5) target bundleno = 314 (0x13a), region = 48 }
 0x138   : > { %v1061_v6 = vpop.f32.mrb[0].mxu0 }
 0x139   : > { %v620_v7 = vpop.f32.mrb[1].mxu0 }
 0x13a PF: > { %p584_p8 = scmp.ne.s32.totalorder %s901_s12, 0 }
 0x13b   : > { %v300_v9 = vrot.slane (!%p584_p8), %v1061_v6, 4  ;;  %v309_v10 = vmul.f32 (!%p584_p8), %v1061_v6, %v1061_v6  ;;  %v299_v19 = vld [vmem:[#allocation2] sm:$0x1] (!%p584_p8)  ;;  %v308_v22 = vld [vmem:[#allocation3] sm:$0x1] (!%p584_p8) }
 0x13c   : > { %298 = sbr.rel (%p584_p8) target bundleno = 332 (0x14c), region = 52 }
 0x13d   : > { %v301_v11 = vadd.f32 (!%p584_p8), %v300_v9, %v1061_v6  ;;  %v310_v12 = vrot.slane (!%p584_p8), %v309_v10, 4 }
 0x13f   : > { %v302_v13 = vrot.slane (!%p584_p8), %v301_v11, 2  ;;  %v311_v14 = vadd.f32 (!%p584_p8), %v310_v12, %v309_v10 }
 0x141   : > { %v303_v15 = vadd.f32 (!%p584_p8), %v302_v13, %v301_v11  ;;  %v312_v16 = vrot.slane (!%p584_p8), %v311_v14, 2 }
 0x143   : > { %v304_v17 = vrot.slane %v303_v15, 1  ;;  %v313_v18 = vadd.f32 %v312_v16, %v311_v14 }
 0x145   : > { %v305_v20 = vadd.f32 %v304_v17, %v303_v15  ;;  %v314_v21 = vrot.slane %v313_v18, 1 }
 0x147   : > { %v306_v23 = vadd.f32 %v305_v20, %v299_v19  ;;  %v315_v24 = vadd.f32 %v314_v21, %v313_v18 }
 0x149   : > { %307 = vst [vmem:[#allocation2] sm:$0x1] %v306_v23  ;;  %v316_v25 = vadd.f32 %v315_v24, %v308_v22 }
 0x14b   : > { %317 = vst [vmem:[#allocation3] sm:$0x1] %v316_v25 }
 0x14c PF: > { %p585_p6 = scmp.ne.s32.totalorder %s901_s12, 1 }
 0x14d   : > { %v359_v26 = vld [vmem:[#allocation7 + $0x10] sm:$0xff] (!%p585_p6)  ;;  %v360_v27 = vld [vmem:[#allocation7 + $0x18] sm:$0xff] (!%p585_p6)  ;;  %v361_v28 = vld [vmem:[#allocation7 + $0x20] sm:$0xff] (!%p585_p6)  ;;  %v920_v29 = vmov (!%p585_p6), 0.0|0.0   ;;  %vm921_vm2 = vmmov (!%p585_p6), 0   ;;  %v922_v32 = vmov (!%p585_p6), 0.0   ;;  %v335_v44 = vlaneseq (!%p585_p6) }
 0x14e   : > { %321 = sbr.rel (%p585_p6) target bundleno = 618 (0x26a), region = 56  ;;  %659 = vmatprep.subr.bf16.mxu0 (!%p585_p6), %v920_v29  ;;  %v660_v30 = vpack.c.bf16 (!%p585_p6), %v360_v27, %v359_v26  ;;  %v362_v31 = vld [vmem:[#allocation7 + $0x28] sm:$0xff] (!%p585_p6)  ;;  %653 = vmatprep.mubr.msk.f32.mxu0 (!%p585_p6), %vm921_vm2, %v922_v32  ;;  %v363_v34 = vld [vmem:[#allocation7 + $0x30] sm:$0xff] (!%p585_p6)  ;;  %v364_v35 = vld [vmem:[#allocation7 + $0x38] sm:$0xff] (!%p585_p6) }
 0x14f   : > { %v663_v33 = vpack.c.bf16 (!%p585_p6), %v362_v31, %v361_v28  ;;  %v666_v40 = vpack.c.bf16 (!%p585_p6), %v364_v35, %v363_v34  ;;  %v365_v41 = vld [vmem:[#allocation7 + $0x40] sm:$0xff] (!%p585_p6)  ;;  %v366_v42 = vld [vmem:[#allocation7 + $0x48] sm:$0xff] (!%p585_p6)  ;;  %v367_v47 = vld [vmem:[#allocation7 + $0x50] sm:$0xff] (!%p585_p6)  ;;  %v336_v50 = vshrl.u32 (!%p585_p6), %v335_v44, 7  ;;  %v464_v21 = vand.u32 (!%p585_p6), 127, %v335_v44 }
 0x150   : > { %661 = vmatpush3.bf16.msra.mxu0 (!%p585_p6), %v660_v30  ;;  %v322_v36 = vld [vmem:[#allocation2] sm:$0x1] (!%p585_p6)  ;;  %v669_v46 = vpack.c.bf16 (!%p585_p6), %v366_v42, %v365_v41  ;;  %v368_v48 = vld [vmem:[#allocation7 + $0x58] sm:$0xff] (!%p585_p6)  ;;  %v369_v53 = vld [vmem:[#allocation7 + $0x60] sm:$0xff] (!%p585_p6) }
 0x151   : > { %662 = vmatprep.subr.bf16.mxu0 (!%p585_p6), %v920_v29  ;;  %v323_v38 = vmul.f32 (!%p585_p6), 0.125, %v322_v36  ;;  %v672_v52 = vpack.c.bf16 (!%p585_p6), %v368_v48, %v367_v47  ;;  %v370_v54 = vld [vmem:[#allocation7 + $0x68] sm:$0xff] (!%p585_p6)  ;;  %v337_v55 = vsub.s32 (!%p585_p6), 0, %v336_v50  ;;  %v371_v57 = vld [vmem:[#allocation7 + $0x70] sm:$0xff] (!%p585_p6)  ;;  %v372_v58 = vld [vmem:[#allocation7 + $0x78] sm:$0xff] (!%p585_p6)  ;;  %vm465_vm5 = vcmp.lt.s32.totalorder (!%p585_p6), %v464_v21, 32 }
 0x152   : > { %v324_v37 = vld [vmem:[#allocation3] sm:$0x1] (!%p585_p6)  ;;  %v675_v56 = vpack.c.bf16 (!%p585_p6), %v370_v54, %v369_v53  ;;  %v678_v60 = vpack.c.bf16 (!%p585_p6), %v372_v58, %v371_v57  ;;  %v373_v61 = vld [vmem:[#allocation7 + $0x80] sm:$0xff] (!%p585_p6)  ;;  %v374_v62 = vld [vmem:[#allocation7 + $0x88] sm:$0xff] (!%p585_p6) }
 0x153   : > { %v325_v39 = vmul.f32 (!%p585_p6), 0.125, %v324_v37  ;;  %v326_v43 = vmul.f32 (!%p585_p6), %v323_v38, %v323_v38  ;;  %v338_v59 = vrot.slane (!%p585_p6), %v323_v38, %v337_v55  ;;  %v681_v1 = vpack.c.bf16 (!%p585_p6), %v374_v62, %v373_v61  ;;  %v586_v3 = vld [vmem:[#allocation9] ss:$0 sm:$0xff] (!%p585_p6)  ;;  %v587_v5 = vld [vmem:[#allocation9 + $0x1] ss:$0 sm:$0xff] (!%p585_p6) }
 0x154   : > { %664 = vmatpush3.bf16.msra.mxu0 (!%p585_p6), %v663_v33  ;;  %v588_v10 = vld [vmem:[#allocation9 + $0x2] ss:$0 sm:$0xff] (!%p585_p6) }
 0x155   : > { %665 = vmatprep.subr.bf16.mxu0 %v920_v29  ;;  %v327_v45 = vsub.f32 %v325_v39, %v326_v43  ;;  %v340_v63 = vsub.f32 %v1061_v6, %v338_v59 }
 0x157   : > { %v328_v49 = vmax.f32 %v327_v45, 0.0 }
 0x158   : > { %667 = vmatpush3.bf16.msra.mxu0 %v666_v40 }
 0x159   : > { %668 = vmatprep.subr.bf16.mxu0 %v920_v29  ;;  %v329_v51 = vadd.f32 1e-05, %v328_v49 }
 0x15b   : > { %759 = vrsqrt.f32 %v329_v51 }
 0x15c   : > { %670 = vmatpush3.bf16.msra.mxu0 %v669_v46 }
 0x15d   : > { %671 = vmatprep.subr.bf16.mxu0 %v920_v29 }
 0x160   : > { %673 = vmatpush3.bf16.msra.mxu0 %v672_v52 }
 0x161   : > { %674 = vmatprep.subr.bf16.mxu0 %v920_v29 }
 0x164   : > { %676 = vmatpush3.bf16.msra.mxu0 %v675_v56 }
 0x165   : > { %677 = vmatprep.subr.bf16.mxu0 %v920_v29  ;;  %v760_v0 = vpop.eup %759 }
 0x166   : > { %v345_v2 = vrot.slane %v760_v0, %v337_v55 }
 0x168   : > { %679 = vmatpush3.bf16.msra.mxu0 %v678_v60  ;;  %v347_v4 = vmul.f32 %v345_v2, %v340_v63 }
 0x169   : > { %680 = vmatprep.subr.bf16.mxu0 %v920_v29 }
 0x16a   : > { %v352_v7 = vmul.f32 %v586_v3, %v347_v4 }
 0x16c   : > { %682 = vmatpush3.bf16.msra.mxu0 %v681_v1  ;;  %v357_v8 = vadd.f32 %v587_v5, %v352_v7 }
 0x16e   : > { %v358_v9 = vmax.f32 %v357_v8, 0.0 }
 0x170   : > { %654 = vmatmul.mubr.f32.vlgmr.msra.gmra.mrb[0].mxu0 %v358_v9 }
 0x243   : > { %v445_v11 = vpop.f32.mrb[0].mxu0 }
 0x244   : > { %v446_v12 = vadd.f32 %v588_v10, %v445_v11  ;;  %v655_v13 = vpop.f32.mrb[1].mxu0 }
 0x246   : > { %v450_v14 = vmin.f32 %v446_v12, 20.0  ;;  %vm449_vm4 = vcmp.gt.f32.partialorder %v446_v12, 20.0 }
 0x248   : > { %v451_v15 = vmul.f32 1.442695, %v450_v14 }
 0x24a   : > { %761 = vpow2.f32 %v451_v15 }
 0x254   : > { %v762_v6 = vpop.eup %761 }
 0x255   : > { %v453_v16 = vadd.f32 1.0, %v762_v6  ;;  %v456_v17 = vmul.f32 -0.5, %v762_v6  ;;  %v459_v19 = vand.u32 2147483647, %v762_v6 }
 0x257   : > { %763 = vlog2.f32 %v453_v16  ;;  %v457_v18 = vadd.f32 1.0, %v456_v17  ;;  %vm460_vm3 = vcmp.lt.f32.partialorder %v459_v19, 0.0004427343 }
 0x259   : > { %v458_v23 = vmul.f32 %v762_v6, %v457_v18 }
 0x261   : > { %v764_v20 = vpop.eup %763 }
 0x262   : > { %v455_v22 = vmul.f32 0.6931472, %v764_v20 }
 0x264   : > { %v461_v24 = vsel %vm460_vm3, %v458_v23, %v455_v22 }
 0x265   : > { %v462_v25 = vsel %vm449_vm4, %v446_v12, %v461_v24 }
 0x266   : > { %v466_v26 = vadd.f32 1e-07, %v462_v25 }
 0x268   : > { %v467_v27 = vsel %vm465_vm5, %v446_v12, %v466_v26 }
 0x269   : > { %468 = vst [vmem:[#allocation10] sm:$0xff] %v467_v27 }
 0x26a PF: > { %p1072_p9 = scmp.eq.s32.totalorder %s572_s17, 1  ;;  %s923_s19 = smov [#allocation10]  }
 0x26b   : > { %s484_s20 = sshll.u32 %s923_s19, 4  ;;  %s485_s20 = int_to_ptr.vmem [resolvable:$true] %s484_s20 }
 0x26c   : > { %s849_s21 = scalar_lea.vmem %s485_s20, 128  ;;  %s855_s29 = scalar_lea.vmem %s485_s20, 256 }
 0x26d   : > { %p850_p10 = scmp.ne.s32.totalorder %s485_s20, %s849_s21  ;;  %p856_p13 = scmp.lt.s32.totalorder %s485_s20, %s485_s20 }
 0x26e   : > { %p857_p0 = scmp.lt.s32.totalorder %s855_s29, %s849_s21 }
 0x26f   : > { %p851_p11 = pnand %p850_p10, %p1072_p9 }
 0x270   : > { %p858_p1 = por %p857_p0, %p856_p13 }
 0x271   : > { %p852_p12 = pneg %p851_p11 }
 0x273   : > { %p859_p4 = pnand %p858_p1, %p852_p12 }
 0x275   : > { %862 = shalt.err (!%p859_p4)
}
 0x276   : > { %s863_s30 = scalar_lea.hbm %s1109_s3, 128 }
 0x277   : > { %p864_p7 = scmp.ne.s32.totalorder %s1109_s3, %s863_s30  ;;  %p869_p5 = scmp.lt.u32.totalorder %s863_s30, %s1109_s3 }
 0x279   : > { %p865_p2 = pnand %p864_p7, %p1072_p9 }
 0x27b   : > { %p866_p3 = pneg %p865_p2 }
 0x27d   : > { %p871_p8 = pnand %p869_p5, %p866_p3 }
 0x27f   : > { %874 = shalt.err (!%p871_p8)
}
 0x280   : > { %696 = dma.vmem_to_hbm [thread:$0]  (%p1072_p9), %s485_s20, 128, %s1109_s3, [#allocation6]  }
 0x281 PF: > { %p720_p6 = scmp.ge.s32.totalorder %s909_s14, 2  ;;  %p721_p10 = scmp.eq.s32.totalorder %s573_s18, 1 }
 0x283   : > { %p710_p11 = pnand %p721_p10, %p720_p6 }
 0x285   : > { %896 = dma.done.wait (!%p710_p11), [#allocation6], 128  }
 0x286   : > { %898 = vsyncadd (!%p710_p11), [#allocation6], 4294967168  ;;  %s18_s14 = sadd.s32 1, %s909_s14   ;;  %s1122_s12 = smov %s905_s13 }
 0x287   : > { %p15_p12 = scmp.ge.s32.totalorder %s18_s14, 4   ;;  %s1123_s13 = smov %s1125_s22 }
 0x289   :  { %17 = sbr.rel (!%p15_p12) target bundleno = 5 (0x5), region = 90 }
 0x290   :  { %502 = vsyncpa [#allocation5], 1 }
 0x291   :  { %504 = vsyncpa [#allocation5 + $0x1], 1 }
 0x292   :  { %505 = vsyncpa [#allocation8], 1 }
 0x293   :  { %506 = vsyncpa [#allocation6], 1 }
 0x294   :  { %508 = vsyncpa [#allocation6 + $0x1], 1 }

</bundles_post_ra>
